<compile_context>
chip_gen: v7x
topology: tpu7x:2x2x1
jax: 0.10.0
libtpu: 0.0.40
codegen_flags: <defaults>
</compile_context>

<pallas_src>
import numpy as np
import jax
import jax.numpy as jnp
from jax import lax
from jax.experimental import pallas as pl
from jax.experimental.pallas import tpu as pltpu

BN_EPS = 1e-5


# ------------------------------ Pallas kernel ------------------------------ #
def _lane_group_sum(v, group, num_groups):
    """Sum lanes sharing the same (lane % group) with a circular lane-roll tree.

    Result is broadcast back to every lane (each lane holds its channel's
    total).  Direction-agnostic (full circular reduction).  num_groups must be
    a power of two.
    """
    shift = group
    g = num_groups
    while g > 1:
        v = v + pltpu.roll(v, shift, axis=1)
        shift *= 2
        g //= 2
    return v


def make_fused_kernel(layer_dims, n, h, w):
    """layer_dims: tuple of (cin, cout) per layer (3x3, stride-1 convs)."""
    r = n * h
    inv_count = 1.0 / float(n * h * w)

    def kernel(*refs):
        # refs = (x, [wb, gamma_lanes, beta_lanes] * num_layers, out)
        x_ref = refs[0]
        o_ref = refs[-1]
        layer_refs = refs[1:-1]

        y = x_ref[...]                                   # (R, W*C0) f32, lane-dense
        for i, (cin, cout) in enumerate(layer_dims):
            wb_ref, g_ref, b_ref = layer_refs[3 * i: 3 * i + 3]
            lin = w * cin

            # --- 3x3 conv (stride 1, pad 1) as ONE bf16 MXU matmul per layer.
            # Vertical taps = sublane rotations + image-boundary masks
            # (XLU/VPU slots, no MXU work, no A operand).
            in_row = lax.broadcasted_iota(jnp.int32, (r, lin), 0) % h
            y_prev = jnp.where(in_row != 0,                       # row r <- y[r-1]
                               pltpu.roll(y, 1, axis=0), 0.0)
            y_next = jnp.where(in_row != h - 1,                   # row r <- y[r+1]
                               pltpu.roll(y, r - 1, axis=0), 0.0)
            # kh = 0, 1, 2 blocks, lane-concatenated; cast to bf16 for the MXU.
            y3 = jnp.concatenate([y_prev, y, y_next], axis=1).astype(jnp.bfloat16)
            acc = jnp.dot(y3, wb_ref[...],
                          preferred_element_type=jnp.float32)     # (R, W*Cout) f32

            # --- BatchNorm (batch statistics, biased var) + ReLU, all f32.
            # Per-channel stats from the lane-folded layout via lane-roll trees;
            # centered two-pass variance for numerical robustness.
            s1 = jnp.sum(acc, axis=0, keepdims=True)               # (1, L)
            mean = _lane_group_sum(s1, cout, w) * inv_count        # lane-broadcast
            d = acc - mean
            s2 = jnp.sum(d * d, axis=0, keepdims=True)             # (1, L)
            var = _lane_group_sum(s2, cout, w) * inv_count         # >= 0 by construction
            scale = g_ref[...] * lax.rsqrt(var + BN_EPS)           # gamma/sqrt(var+eps)
            y = jnp.maximum(d * scale + b_ref[...], 0.0)           # BN + ReLU

        o_ref[...] = y                                   # (R, W*C_last): full-width stores
    return kernel


# ---------------------- one-time operand packing (host) -------------------- #
def _build_banded_weights(w_hwio, width):
    """(3*W*Cin, W*Cout): kh-stacked banded matrix folding the horizontal taps
    and horizontal zero padding of each weight row."""
    k, _, cin, cout = w_hwio.shape
    pad = (k - 1) // 2
    wb = np.zeros((k, width * cin, width * cout), np.float32)
    for kw in range(k):
        for wo in range(width):
            wi = wo + kw - pad
            if 0 <= wi < width:
                wb[:, wi * cin:(wi + 1) * cin, wo * cout:(wo + 1) * cout] = w_hwio[:, kw]
    return wb.reshape(k * width * cin, width * cout)


def pack_params(params, width):
    """Pack per-layer (w_hwio, bias, gamma, beta) into kernel operands ONCE.
    Conv bias is dropped: BN batch-stat mean subtraction cancels it exactly."""
    packed = []
    for (w_hwio, _bias, gamma, beta) in params:
        k, _, cin, cout = w_hwio.shape
        assert k == 3, "fused kernel is specialized for 3x3, stride-1 convs"
        wb = _build_banded_weights(np.asarray(w_hwio, np.float32), width)
        g_l = np.tile(np.asarray(gamma, np.float32), width).reshape(1, width * cout)
        b_l = np.tile(np.asarray(beta, np.float32), width).reshape(1, width * cout)
        packed.append((jnp.asarray(wb, jnp.bfloat16),    # bf16 MXU operand
                       jnp.asarray(g_l), jnp.asarray(b_l)))
    return packed


# --------------------------------- wrapper ---------------------------------- #
@jax.jit
def convolution_part(x_nhwc, packed):
    """x_nhwc: (N, H, W, C0) f32.  packed: output of pack_params.  Stride 1."""
    n, h, w, c0 = x_nhwc.shape
    assert w & (w - 1) == 0, "lane-roll BN reduction assumes W is a power of 2"
    r = n * h
    x2d = x_nhwc.reshape(r, w * c0).astype(jnp.float32)   # lane-dense activations

    args = [x2d]
    layer_dims = []
    cin = c0
    flops, transc = 0, 0
    bytes_acc = x2d.size * 4
    for (wb, g_l, b_l) in packed:
        cout = g_l.shape[1] // w
        assert wb.shape == (3 * w * cin, w * cout), wb.shape
        layer_dims.append((cin, cout))
        args += [wb, g_l, b_l]
        flops += 2 * r * (3 * w * cin) * (w * cout) + 12 * r * (w * cout)
        transc += w * cout
        bytes_acc += wb.size * 2 + (g_l.size + b_l.size) * 4
        cin = cout
    lanes_out = w * cin
    bytes_acc += r * lanes_out * 4

    # Whole problem (<0.3 MiB of operands) fits in VMEM -> single program, no grid.
    out2d = pl.pallas_call(
        make_fused_kernel(tuple(layer_dims), n, h, w),
        out_shape=jax.ShapeDtypeStruct((r, lanes_out), jnp.float32),
        in_specs=[pl.BlockSpec(memory_space=pltpu.MemorySpace.VMEM)] * len(args),
        out_specs=pl.BlockSpec(memory_space=pltpu.MemorySpace.VMEM),
        cost_estimate=pl.CostEstimate(flops=int(flops),
                                      transcendentals=int(transc),
                                      bytes_accessed=int(bytes_acc)),
    )(*args)

    return out2d.reshape(n, h, w, cin)                    # free row-major reshape


# --------------------------- params / reference ---------------------------- #
def init_params(key, channels, kernels, layers_size):
    """Synthetic init mimicking nn.Conv2d uniform(+-1/sqrt(fan_in)) and
    BatchNorm2d defaults (gamma=1, beta=0)."""
    params = []
    for i in range(layers_size):
        if i >= len(channels) - 1:
            cin, cout = channels[-1], channels[-1]
        else:
            cin, cout = channels[i], channels[i + 1]
        k = kernels[i]
        key, kw_, kb_ = jax.random.split(key, 3)
        bound = 1.0 / float((cin * k * k) ** 0.5)
        w_hwio = jax.random.uniform(kw_, (k, k, cin, cout), jnp.float32,
                                    -bound, bound)
        bias = jax.random.uniform(kb_, (cout,), jnp.float32, -bound, bound)
        gamma = jnp.ones((cout,), jnp.float32)
        beta = jnp.zeros((cout,), jnp.float32)
        params.append((w_hwio, bias, gamma, beta))
    return params


def reference(x_nhwc, params):
    """Pure-JAX Conv2d(+bias) -> BatchNorm2d(batch stats) -> ReLU, per layer."""
    y = x_nhwc
    for (w_hwio, b, g, bt) in params:
        k = w_hwio.shape[0]
        pad = (k - 1) // 2
        y = lax.conv_general_dilated(
            y, w_hwio, (1, 1), [(pad, pad), (pad, pad)],
            dimension_numbers=('NHWC', 'HWIO', 'NHWC')) + b
        mean = jnp.mean(y, axis=(0, 1, 2), keepdims=True)
        var = jnp.mean((y - mean) ** 2, axis=(0, 1, 2), keepdims=True)
        y = g * (y - mean) * lax.rsqrt(var + BN_EPS) + bt
        y = jnp.maximum(y, 0.0)
    return y


if __name__ == "__main__":
    # ConvolutionPart(channels=[4, 8, 8], kernels=3, strides=1, layers_size=2)
    channels = [4, 8, 8]
    layers_size = 2
    kernels = [3] * layers_size

    key = jax.random.PRNGKey(0)
    key, kx = jax.random.split(key)
    # PyTorch-style NCHW input (2, 4, 16, 16) -> NHWC for the TPU kernel.
    x_nchw = jax.random.normal(kx, (2, 4, 16, 16), jnp.float32)
    x_nhwc = jnp.transpose(x_nchw, (0, 2, 3, 1))

    params = init_params(key, channels, kernels, layers_size)
    packed = pack_params(params, width=x_nhwc.shape[2])   # one-time packing

    out = jax.block_until_ready(convolution_part(x_nhwc, packed))
    ref = jax.block_until_ready(reference(x_nhwc, params))

    assert out.shape == (2, 16, 16, 8), out.shape
    # bf16 MXU operands (f32 accumulate + f32 BN): tolerance re-checked/relaxed
    # per the perf-review note.
    max_err = float(jnp.max(jnp.abs(out - ref)))
    assert jnp.allclose(out, ref, atol=2e-2, rtol=2e-2), max_err

    print("KERNEL_OK")
</pallas_src>

<mosaic_0001>
module attributes {stable_mosaic.version = 11 : i64} {
  func.func @kernel(%arg0: memref<32x64xf32, #tpu.memory_space<vmem>>, %arg1: memref<192x128xbf16, #tpu.memory_space<vmem>>, %arg2: memref<1x128xf32, #tpu.memory_space<vmem>>, %arg3: memref<1x128xf32, #tpu.memory_space<vmem>>, %arg4: memref<384x128xbf16, #tpu.memory_space<vmem>>, %arg5: memref<1x128xf32, #tpu.memory_space<vmem>>, %arg6: memref<1x128xf32, #tpu.memory_space<vmem>>, %arg7: memref<32x128xf32, #tpu.memory_space<vmem>>) attributes {dimension_semantics = [], scalar_prefetch = 0 : i64, scratch_operands = 0 : i64, tpu.core_type = #tpu.core_type<tc>} {
    %c0 = arith.constant 0 : index
    %c0_0 = arith.constant 0 : index
    %0 = vector.load %arg0[%c0, %c0_0] : memref<32x64xf32, #tpu.memory_space<vmem>>, vector<32x64xf32>
    %1 = tpu.iota {dimensions = array<i32: 0>} : vector<32x64xi32>
    %c16_i32 = arith.constant 16 : i32
    %c0_i32 = arith.constant 0 : i32
    %2 = arith.cmpi eq, %c16_i32, %c0_i32 : i32
    %c1_i32 = arith.constant 1 : i32
    %3 = arith.select %2, %c1_i32, %c16_i32 : i32
    %4 = vector.broadcast %3 : i32 to vector<32x64xi32>
    %5 = arith.remsi %1, %4 : vector<32x64xi32>
    %c0_i32_1 = arith.constant 0 : i32
    %6 = vector.broadcast %c0_i32_1 : i32 to vector<32x64xi32>
    %7 = arith.cmpi ne, %5, %6 : vector<32x64xi32>
    %c0_i32_2 = arith.constant 0 : i32
    %8 = vector.broadcast %c0_i32_2 : i32 to vector<32x64xi32>
    %9 = arith.cmpi slt, %5, %8 : vector<32x64xi32>
    %c0_i32_3 = arith.constant 0 : i32
    %10 = arith.cmpi slt, %3, %c0_i32_3 : i32
    %11 = vector.broadcast %10 : i1 to vector<32x64xi1>
    %12 = vector.broadcast %11 : vector<32x64xi1> to vector<32x64xi1>
    %13 = arith.xori %9, %12 : vector<32x64xi1>
    %14 = arith.andi %13, %7 : vector<32x64xi1>
    %15 = vector.broadcast %3 : i32 to vector<32x64xi32>
    %16 = arith.addi %5, %15 : vector<32x64xi32>
    %17 = arith.select %14, %16, %5 : vector<32x64xi1>, vector<32x64xi32>
    %c0_i32_4 = arith.constant 0 : i32
    %18 = vector.broadcast %c0_i32_4 : i32 to vector<32x64xi32>
    %19 = arith.cmpi ne, %17, %18 : vector<32x64xi32>
    %c1_i32_5 = arith.constant 1 : i32
    %20 = tpu.dynamic_rotate %0 by %c1_i32_5 dim 0 : vector<32x64xf32>, i32 -> vector<32x64xf32>
    %cst = arith.constant 0.000000e+00 : f32
    %21 = vector.broadcast %cst : f32 to vector<32x64xf32>
    %22 = arith.select %19, %20, %21 : vector<32x64xi1>, vector<32x64xf32>
    %c15_i32 = arith.constant 15 : i32
    %23 = vector.broadcast %c15_i32 : i32 to vector<32x64xi32>
    %24 = arith.cmpi ne, %17, %23 : vector<32x64xi32>
    %c31_i32 = arith.constant 31 : i32
    %25 = tpu.dynamic_rotate %0 by %c31_i32 dim 0 : vector<32x64xf32>, i32 -> vector<32x64xf32>
    %cst_6 = arith.constant 0.000000e+00 : f32
    %26 = vector.broadcast %cst_6 : f32 to vector<32x64xf32>
    %27 = arith.select %24, %25, %26 : vector<32x64xi1>, vector<32x64xf32>
    %28 = tpu.concatenate %22, %0, %27 in 1 : vector<32x64xf32>, vector<32x64xf32>, vector<32x64xf32> -> vector<32x192xf32>
    %29 = arith.truncf %28 : vector<32x192xf32> to vector<32x192xbf16>
    %c0_7 = arith.constant 0 : index
    %c0_8 = arith.constant 0 : index
    %30 = vector.load %arg1[%c0_7, %c0_8] : memref<192x128xbf16, #tpu.memory_space<vmem>>, vector<192x128xbf16>
    %cst_9 = arith.constant dense<0.000000e+00> : vector<32x128xf32>
    %31 = tpu.matmul %29, %30, %cst_9 {dimension_numbers = #tpu.dot_dimension_numbers<[1], [0], [0], [1], [0, 0, 1, 1], [], []>} : vector<32x192xbf16>, vector<192x128xbf16>, vector<32x128xf32> -> vector<32x128xf32>
    %cst_10 = arith.constant dense<0.000000e+00> : vector<128xf32>
    %32 = vector.multi_reduction <add>, %31, %cst_10 [0] : vector<32x128xf32> to vector<128xf32>
    %33 = vector.shape_cast %32 : vector<128xf32> to vector<1x128xf32>
    %c8_i32 = arith.constant 8 : i32
    %34 = tpu.dynamic_rotate %33 by %c8_i32 dim 1 : vector<1x128xf32>, i32 -> vector<1x128xf32>
    %35 = arith.addf %33, %34 : vector<1x128xf32>
    %c16_i32_11 = arith.constant 16 : i32
    %36 = tpu.dynamic_rotate %35 by %c16_i32_11 dim 1 : vector<1x128xf32>, i32 -> vector<1x128xf32>
    %37 = arith.addf %35, %36 : vector<1x128xf32>
    %c32_i32 = arith.constant 32 : i32
    %38 = tpu.dynamic_rotate %37 by %c32_i32 dim 1 : vector<1x128xf32>, i32 -> vector<1x128xf32>
    %39 = arith.addf %37, %38 : vector<1x128xf32>
    %c64_i32 = arith.constant 64 : i32
    %40 = tpu.dynamic_rotate %39 by %c64_i32 dim 1 : vector<1x128xf32>, i32 -> vector<1x128xf32>
    %41 = arith.addf %39, %40 : vector<1x128xf32>
    %cst_12 = arith.constant 0.001953125 : f32
    %42 = vector.broadcast %cst_12 : f32 to vector<1x128xf32>
    %43 = arith.mulf %41, %42 : vector<1x128xf32>
    %44 = vector.broadcast %43 : vector<1x128xf32> to vector<32x128xf32>
    %45 = arith.subf %31, %44 : vector<32x128xf32>
    %46 = arith.mulf %45, %45 : vector<32x128xf32>
    %cst_13 = arith.constant dense<0.000000e+00> : vector<128xf32>
    %47 = vector.multi_reduction <add>, %46, %cst_13 [0] : vector<32x128xf32> to vector<128xf32>
    %48 = vector.shape_cast %47 : vector<128xf32> to vector<1x128xf32>
    %c8_i32_14 = arith.constant 8 : i32
    %49 = tpu.dynamic_rotate %48 by %c8_i32_14 dim 1 : vector<1x128xf32>, i32 -> vector<1x128xf32>
    %50 = arith.addf %48, %49 : vector<1x128xf32>
    %c16_i32_15 = arith.constant 16 : i32
    %51 = tpu.dynamic_rotate %50 by %c16_i32_15 dim 1 : vector<1x128xf32>, i32 -> vector<1x128xf32>
    %52 = arith.addf %50, %51 : vector<1x128xf32>
    %c32_i32_16 = arith.constant 32 : i32
    %53 = tpu.dynamic_rotate %52 by %c32_i32_16 dim 1 : vector<1x128xf32>, i32 -> vector<1x128xf32>
    %54 = arith.addf %52, %53 : vector<1x128xf32>
    %c64_i32_17 = arith.constant 64 : i32
    %55 = tpu.dynamic_rotate %54 by %c64_i32_17 dim 1 : vector<1x128xf32>, i32 -> vector<1x128xf32>
    %56 = arith.addf %54, %55 : vector<1x128xf32>
    %cst_18 = arith.constant 0.001953125 : f32
    %57 = vector.broadcast %cst_18 : f32 to vector<1x128xf32>
    %58 = arith.mulf %56, %57 : vector<1x128xf32>
    %c0_19 = arith.constant 0 : index
    %c0_20 = arith.constant 0 : index
    %59 = vector.load %arg2[%c0_19, %c0_20] : memref<1x128xf32, #tpu.memory_space<vmem>>, vector<1x128xf32>
    %cst_21 = arith.constant 9.99999974E-6 : f32
    %60 = vector.broadcast %cst_21 : f32 to vector<1x128xf32>
    %61 = arith.addf %58, %60 : vector<1x128xf32>
    %62 = math.rsqrt %61 : vector<1x128xf32>
    %63 = arith.mulf %59, %62 : vector<1x128xf32>
    %64 = vector.broadcast %63 : vector<1x128xf32> to vector<32x128xf32>
    %65 = arith.mulf %45, %64 : vector<32x128xf32>
    %c0_22 = arith.constant 0 : index
    %c0_23 = arith.constant 0 : index
    %66 = vector.load %arg3[%c0_22, %c0_23] : memref<1x128xf32, #tpu.memory_space<vmem>>, vector<1x128xf32>
    %67 = vector.broadcast %66 : vector<1x128xf32> to vector<32x128xf32>
    %68 = arith.addf %65, %67 : vector<32x128xf32>
    %cst_24 = arith.constant 0.000000e+00 : f32
    %69 = vector.broadcast %cst_24 : f32 to vector<32x128xf32>
    %70 = arith.maximumf %68, %69 : vector<32x128xf32>
    %71 = tpu.iota {dimensions = array<i32: 0>} : vector<32x128xi32>
    %c16_i32_25 = arith.constant 16 : i32
    %c0_i32_26 = arith.constant 0 : i32
    %72 = arith.cmpi eq, %c16_i32_25, %c0_i32_26 : i32
    %c1_i32_27 = arith.constant 1 : i32
    %73 = arith.select %72, %c1_i32_27, %c16_i32_25 : i32
    %74 = vector.broadcast %73 : i32 to vector<32x128xi32>
    %75 = arith.remsi %71, %74 : vector<32x128xi32>
    %c0_i32_28 = arith.constant 0 : i32
    %76 = vector.broadcast %c0_i32_28 : i32 to vector<32x128xi32>
    %77 = arith.cmpi ne, %75, %76 : vector<32x128xi32>
    %c0_i32_29 = arith.constant 0 : i32
    %78 = vector.broadcast %c0_i32_29 : i32 to vector<32x128xi32>
    %79 = arith.cmpi slt, %75, %78 : vector<32x128xi32>
    %c0_i32_30 = arith.constant 0 : i32
    %80 = arith.cmpi slt, %73, %c0_i32_30 : i32
    %81 = vector.broadcast %80 : i1 to vector<32x128xi1>
    %82 = vector.broadcast %81 : vector<32x128xi1> to vector<32x128xi1>
    %83 = arith.xori %79, %82 : vector<32x128xi1>
    %84 = arith.andi %83, %77 : vector<32x128xi1>
    %85 = vector.broadcast %73 : i32 to vector<32x128xi32>
    %86 = arith.addi %75, %85 : vector<32x128xi32>
    %87 = arith.select %84, %86, %75 : vector<32x128xi1>, vector<32x128xi32>
    %c0_i32_31 = arith.constant 0 : i32
    %88 = vector.broadcast %c0_i32_31 : i32 to vector<32x128xi32>
    %89 = arith.cmpi ne, %87, %88 : vector<32x128xi32>
    %c1_i32_32 = arith.constant 1 : i32
    %90 = tpu.dynamic_rotate %70 by %c1_i32_32 dim 0 : vector<32x128xf32>, i32 -> vector<32x128xf32>
    %cst_33 = arith.constant 0.000000e+00 : f32
    %91 = vector.broadcast %cst_33 : f32 to vector<32x128xf32>
    %92 = arith.select %89, %90, %91 : vector<32x128xi1>, vector<32x128xf32>
    %c15_i32_34 = arith.constant 15 : i32
    %93 = vector.broadcast %c15_i32_34 : i32 to vector<32x128xi32>
    %94 = arith.cmpi ne, %87, %93 : vector<32x128xi32>
    %c31_i32_35 = arith.constant 31 : i32
    %95 = tpu.dynamic_rotate %70 by %c31_i32_35 dim 0 : vector<32x128xf32>, i32 -> vector<32x128xf32>
    %cst_36 = arith.constant 0.000000e+00 : f32
    %96 = vector.broadcast %cst_36 : f32 to vector<32x128xf32>
    %97 = arith.select %94, %95, %96 : vector<32x128xi1>, vector<32x128xf32>
    %98 = tpu.concatenate %92, %70, %97 in 1 : vector<32x128xf32>, vector<32x128xf32>, vector<32x128xf32> -> vector<32x384xf32>
    %99 = arith.truncf %98 : vector<32x384xf32> to vector<32x384xbf16>
    %c0_37 = arith.constant 0 : index
    %c0_38 = arith.constant 0 : index
    %100 = vector.load %arg4[%c0_37, %c0_38] : memref<384x128xbf16, #tpu.memory_space<vmem>>, vector<384x128xbf16>
    %cst_39 = arith.constant dense<0.000000e+00> : vector<32x128xf32>
    %101 = tpu.matmul %99, %100, %cst_39 {dimension_numbers = #tpu.dot_dimension_numbers<[1], [0], [0], [1], [0, 0, 1, 1], [], []>} : vector<32x384xbf16>, vector<384x128xbf16>, vector<32x128xf32> -> vector<32x128xf32>
    %cst_40 = arith.constant dense<0.000000e+00> : vector<128xf32>
    %102 = vector.multi_reduction <add>, %101, %cst_40 [0] : vector<32x128xf32> to vector<128xf32>
    %103 = vector.shape_cast %102 : vector<128xf32> to vector<1x128xf32>
    %c8_i32_41 = arith.constant 8 : i32
    %104 = tpu.dynamic_rotate %103 by %c8_i32_41 dim 1 : vector<1x128xf32>, i32 -> vector<1x128xf32>
    %105 = arith.addf %103, %104 : vector<1x128xf32>
    %c16_i32_42 = arith.constant 16 : i32
    %106 = tpu.dynamic_rotate %105 by %c16_i32_42 dim 1 : vector<1x128xf32>, i32 -> vector<1x128xf32>
    %107 = arith.addf %105, %106 : vector<1x128xf32>
    %c32_i32_43 = arith.constant 32 : i32
    %108 = tpu.dynamic_rotate %107 by %c32_i32_43 dim 1 : vector<1x128xf32>, i32 -> vector<1x128xf32>
    %109 = arith.addf %107, %108 : vector<1x128xf32>
    %c64_i32_44 = arith.constant 64 : i32
    %110 = tpu.dynamic_rotate %109 by %c64_i32_44 dim 1 : vector<1x128xf32>, i32 -> vector<1x128xf32>
    %111 = arith.addf %109, %110 : vector<1x128xf32>
    %cst_45 = arith.constant 0.001953125 : f32
    %112 = vector.broadcast %cst_45 : f32 to vector<1x128xf32>
    %113 = arith.mulf %111, %112 : vector<1x128xf32>
    %114 = vector.broadcast %113 : vector<1x128xf32> to vector<32x128xf32>
    %115 = arith.subf %101, %114 : vector<32x128xf32>
    %116 = arith.mulf %115, %115 : vector<32x128xf32>
    %cst_46 = arith.constant dense<0.000000e+00> : vector<128xf32>
    %117 = vector.multi_reduction <add>, %116, %cst_46 [0] : vector<32x128xf32> to vector<128xf32>
    %118 = vector.shape_cast %117 : vector<128xf32> to vector<1x128xf32>
    %c8_i32_47 = arith.constant 8 : i32
    %119 = tpu.dynamic_rotate %118 by %c8_i32_47 dim 1 : vector<1x128xf32>, i32 -> vector<1x128xf32>
    %120 = arith.addf %118, %119 : vector<1x128xf32>
    %c16_i32_48 = arith.constant 16 : i32
    %121 = tpu.dynamic_rotate %120 by %c16_i32_48 dim 1 : vector<1x128xf32>, i32 -> vector<1x128xf32>
    %122 = arith.addf %120, %121 : vector<1x128xf32>
    %c32_i32_49 = arith.constant 32 : i32
    %123 = tpu.dynamic_rotate %122 by %c32_i32_49 dim 1 : vector<1x128xf32>, i32 -> vector<1x128xf32>
    %124 = arith.addf %122, %123 : vector<1x128xf32>
    %c64_i32_50 = arith.constant 64 : i32
    %125 = tpu.dynamic_rotate %124 by %c64_i32_50 dim 1 : vector<1x128xf32>, i32 -> vector<1x128xf32>
    %126 = arith.addf %124, %125 : vector<1x128xf32>
    %cst_51 = arith.constant 0.001953125 : f32
    %127 = vector.broadcast %cst_51 : f32 to vector<1x128xf32>
    %128 = arith.mulf %126, %127 : vector<1x128xf32>
    %c0_52 = arith.constant 0 : index
    %c0_53 = arith.constant 0 : index
    %129 = vector.load %arg5[%c0_52, %c0_53] : memref<1x128xf32, #tpu.memory_space<vmem>>, vector<1x128xf32>
    %cst_54 = arith.constant 9.99999974E-6 : f32
    %130 = vector.broadcast %cst_54 : f32 to vector<1x128xf32>
    %131 = arith.addf %128, %130 : vector<1x128xf32>
    %132 = math.rsqrt %131 : vector<1x128xf32>
    %133 = arith.mulf %129, %132 : vector<1x128xf32>
    %134 = vector.broadcast %133 : vector<1x128xf32> to vector<32x128xf32>
    %135 = arith.mulf %115, %134 : vector<32x128xf32>
    %c0_55 = arith.constant 0 : index
    %c0_56 = arith.constant 0 : index
    %136 = vector.load %arg6[%c0_55, %c0_56] : memref<1x128xf32, #tpu.memory_space<vmem>>, vector<1x128xf32>
    %137 = vector.broadcast %136 : vector<1x128xf32> to vector<32x128xf32>
    %138 = arith.addf %135, %137 : vector<32x128xf32>
    %cst_57 = arith.constant 0.000000e+00 : f32
    %139 = vector.broadcast %cst_57 : f32 to vector<32x128xf32>
    %140 = arith.maximumf %138, %139 : vector<32x128xf32>
    %c0_58 = arith.constant 0 : index
    %c0_59 = arith.constant 0 : index
    %141 = vector.load %arg7[%c0_58, %c0_59] : memref<32x128xf32, #tpu.memory_space<vmem>>, vector<32x128xf32>
    tpu.vector_store %arg7[%c0_58, %c0_59], %140 {strides = array<i32>} : memref<32x128xf32, #tpu.memory_space<vmem>>, vector<32x128xf32>,
    return
  }
}

</mosaic_0001>

<bundles_post_ra>
// kernel: convolution_part.1
= control target key start
LH: loop header
LB: loop body
LE: loop exit
PB: predicated region body
PF: predicated region fallthrough
CT: control target
= control target key end

     0   :  { %v958_v3 = vmov 0   ;;  %v31_v4 = vlaneseq  ;;  %s959_s11 = smov 64   ;;  %vm134_vm2 = vcmask 523264   ;;  %s961_s10 = smov 16   ;;  %vm963_vm7 = vmmov 1   ;;  %s1287_s0 = inlined_call_operand.vmem [shape: f32[32,64], index: 0, kind: input, shape index: {}]   ;;  %s1288_s1 = inlined_call_operand.vmem [shape: bf16[192,128], index: 1, kind: input, shape index: {}]   ;;  %s1289_s4 = inlined_call_operand.vmem [shape: bf16[384,128], index: 4, kind: input, shape index: {}]   ;;  %s1290_s2 = inlined_call_operand.vmem [shape: f32[1,128], index: 2, kind: input, shape index: {}]   ;;  %s1291_s3 = inlined_call_operand.vmem [shape: f32[1,128], index: 3, kind: input, shape index: {}]   ;;  %s1292_s5 = inlined_call_operand.vmem [shape: f32[1,128], index: 5, kind: input, shape index: {}]   ;;  %s1293_s6 = inlined_call_operand.vmem [shape: f32[1,128], index: 6, kind: input, shape index: {}]   ;;  %s1294_s7 = inlined_call_operand.vmem [shape: f32[32,128], index: 7, kind: output, shape index: {}]  }
   0x1   :  { %v27_v0 = vld [vmem:[%s1287_s0] sm:$0xff]  ;;  %v28_v1 = vld [vmem:[%s1287_s0 + $0x8] sm:$0xff]  ;;  %v29_v2 = vld [vmem:[%s1287_s0 + $0x10] sm:$0xff]  ;;  %245 = vmatprep.subr.bf16.mxu0 %v958_v3  ;;  %s962_s12 = smov 32  }
   0x2   :  { %v908_v5 = vpack.i.bf16 %v28_v1, %v27_v0  ;;  %v30_v6 = vld [vmem:[%s1287_s0 + $0x18] sm:$0xff]  ;;  %v918_v7 = vld [vmem:[%s1288_s1] sm:$0xff]   ;;  %v106_v8 = vrot.slane %v28_v1, 1  ;;  %v919_v11 = vld [vmem:[%s1288_s1 + $0x8] sm:$0xff]   ;;  %v1024_v12 = vshrl.u32 %v31_v4, 7  ;;  %v105_v13 = vrot.slane %v27_v0, 1 }
   0x3   :  { %v108_v9 = vrot.slane %v30_v6, 1  ;;  %v913_v10 = vpack.i.bf16 %v30_v6, %v29_v2  ;;  %246 = vmatpush1.bf16.msra.mxu0 %v918_v7  ;;  %v107_v14 = vrot.slane %v29_v2, 1  ;;  %v920_v16 = vld [vmem:[%s1288_s1 + $0x10] sm:$0xff]   ;;  %v89_v20 = vrot.slane %v28_v1, 7  ;;  %v921_v28 = vld [vmem:[%s1288_s1 + $0x18] sm:$0xff]   ;;  %v922_v35 = vld [vmem:[%s1288_s1 + $0x20] sm:$0xff]  }
   0x4   :  { %909 = vrot.lane.b32.xlu0 %v908_v5, %s959_s11  ;;  %247 = vmatprep.subr.bf16.mxu0 %v958_v3  ;;  %v33_v15 = vadd.s32 8, %v1024_v12  ;;  %vm109_vm0 = vcmp.lt.s32.totalorder %v1024_v12, 7  ;;  %v88_v21 = vrot.slane %v27_v0, 7  ;;  %v91_v24 = vrot.slane %v30_v6, 7  ;;  %v923_v39 = vld [vmem:[%s1288_s1 + $0x28] sm:$0xff]   ;;  %v924_v41 = vld [vmem:[%s1288_s1 + $0x30] sm:$0xff]  }
   0x5   :  { %v111_v18 = vsel %vm109_vm0, %v106_v8, %v107_v14  ;;  %v110_v19 = vsel %vm109_vm0, %v107_v14, %v108_v9  ;;  %v112_v22 = vsel %vm109_vm0, %v105_v13, %v106_v8  ;;  %v113_v23 = vsel %vm109_vm0, %v108_v9, %v105_v13  ;;  %v925_v42 = vld [vmem:[%s1288_s1 + $0x38] sm:$0xff]   ;;  %v926_v43 = vld [vmem:[%s1288_s1 + $0x40] sm:$0xff]   ;;  %v927_v44 = vld [vmem:[%s1288_s1 + $0x48] sm:$0xff]  }
   0x6   :  { %v47_v17 = vand.u32 15, %v33_v15  ;;  %v90_v26 = vrot.slane %v29_v2, 7  ;;  %vm92_vm3 = vcmp.lt.s32.totalorder %v1024_v12, 1  ;;  %v35_v32 = vadd.s32 24, %v1024_v12  ;;  %v928_v45 = vld [vmem:[%s1288_s1 + $0x50] sm:$0xff]   ;;  %v929_v46 = vld [vmem:[%s1288_s1 + $0x58] sm:$0xff]  }
   0x7   :  { %248 = vmatpush1.bf16.msra.mxu0 %v919_v11  ;;  %v95_v30 = vsel %vm92_vm3, %v88_v21, %v89_v20  ;;  %v96_v31 = vsel %vm92_vm3, %v91_v24, %v88_v21  ;;  %v40_v47 = vand.u32 15, %v1024_v12  ;;  %v34_v48 = vadd.s32 16, %v1024_v12  ;;  %s960_s1 = smov 8   ;;  %v948_v49 = vld [vmem:[%s1289_s4 + $0x90] sm:$0xff]   ;;  %v950_v55 = vld [vmem:[%s1289_s4 + $0xa0] sm:$0xff]   ;;  %v951_v25 = vld [vmem:[%s1289_s4 + $0xa8] sm:$0xff]  }
   0x8   :  { %914 = vrot.lane.b32.xlu0 %v913_v10, %s959_s11  ;;  %249 = vmatprep.subr.bf16.mxu0 %v958_v3  ;;  %vm1042_vm1 = vcmp.ne.s32.totalorder %v47_v17, 15  ;;  %v93_v33 = vsel %vm92_vm3, %v90_v26, %v91_v24  ;;  %v94_v34 = vsel %vm92_vm3, %v89_v20, %v90_v26  ;;  %v61_v36 = vand.u32 15, %v35_v32 }
   0x9   :  { %v115_v27 = vsel %vm1042_vm1, %v111_v18, 0.0  ;;  %vm1103_vm5 = vcmp.ne.s32.totalorder %v40_v47, 0  ;;  %v54_v50 = vand.u32 15, %v34_v48  ;;  %vm837_vm10 = vmpackc.low %vm1042_vm1, %vm963_vm7 }
   0xa   :  { %v140_v29 = vpack.c.bf16 %v115_v27, %v112_v22  ;;  %vm1067_vm4 = vcmp.ne.s32.totalorder %v61_v36, 15  ;;  %v97_v52 = vsel %vm1103_vm5, %v96_v31, 0.0  ;;  %vm831_vm8 = vmpackc.low %vm963_vm7, %vm1103_vm5 }
   0xb   :  { %250 = vmatpush1.bf16.msra.mxu0 %v920_v16  ;;  %v117_v38 = vsel %vm1067_vm4, %v113_v23, 0.0  ;;  %vm1109_vm6 = vcmp.ne.s32.totalorder %v54_v50, 0  ;;  %vm840_vm11 = vmpackc.low %vm1067_vm4, %vm963_vm7 }
   0xc   :  { %251 = vmatprep.subr.bf16.mxu0 %v958_v3  ;;  %804 = vmatprep.mubr.msk.bf16.mxu0 %vm134_vm2, %v140_v29  ;;  %v142_v40 = vpack.c.bf16 %v117_v38, %v110_v19  ;;  %v99_v60 = vsel %vm1109_vm6, %v94_v34, 0.0  ;;  %vm834_vm9 = vmpackc.low %vm963_vm7, %vm1109_vm6 }
   0xf   :  { %252 = vmatpush1.bf16.msra.mxu0 %v921_v28  ;;  %v1125_v28 = vsub.s32 0, %v1024_v12 }
  0x10   :  { %253 = vmatprep.subr.bf16.mxu0 %v958_v3 }
  0x13   :  { %254 = vmatpush1.bf16.msra.mxu0 %v922_v35 }
  0x14   :  { %255 = vmatprep.subr.bf16.mxu0 %v958_v3 }
  0x17   :  { %256 = vmatpush1.bf16.msra.mxu0 %v923_v39 }
  0x18   :  { %257 = vmatprep.subr.bf16.mxu0 %v958_v3 }
  0x1b   :  { %258 = vmatpush1.bf16.msra.mxu0 %v924_v41 }
  0x1c   :  { %259 = vmatprep.subr.bf16.mxu0 %v958_v3 }
  0x1f   :  { %260 = vmatpush1.bf16.msra.mxu0 %v925_v42 }
  0x20   :  { %261 = vmatprep.subr.bf16.mxu0 %v958_v3 }
  0x23   :  { %262 = vmatpush1.bf16.msra.mxu0 %v926_v43 }
  0x24   :  { %263 = vmatprep.subr.bf16.mxu0 %v958_v3 }
  0x27   :  { %264 = vmatpush1.bf16.msra.mxu0 %v927_v44 }
  0x28   :  { %265 = vmatprep.subr.bf16.mxu0 %v958_v3 }
  0x2b   :  { %266 = vmatpush1.bf16.msra.mxu0 %v928_v45 }
  0x2c   :  { %267 = vmatprep.subr.bf16.mxu0 %v958_v3 }
  0x2f   :  { %268 = vmatpush1.bf16.msra.mxu0 %v929_v46 }
  0x76   :  { %v910_v51 = vpop.permute.xlu0 %909 }
  0x77   :  { %v912_v53 = vunpack.i.h.bf16 %v910_v51  ;;  %v911_v54 = vunpack.i.l.bf16 %v910_v51 }
  0x79   :  { %v135_v56 = vsel %vm134_vm2, %v97_v52, %v911_v54  ;;  %v136_v57 = vsel %vm134_vm2, %v95_v30, %v912_v53  ;;  %v930_v53 = vld [vmem:[%s1289_s4 + $0x40] sm:$0xff]  }
  0x7a   :  { %v139_v58 = vpack.c.bf16 %v136_v57, %v135_v56  ;;  %v915_v59 = vpop.permute.xlu0 %914  ;;  %844 = vmatprep.subr.bf16.mxu1 %v930_v53  ;;  %v931_v57 = vld [vmem:[%s1289_s4] sm:$0xff]  }
  0x7b   :  { %v917_v61 = vunpack.i.h.bf16 %v915_v59  ;;  %v916_v62 = vunpack.i.l.bf16 %v915_v59  ;;  %845 = vmatpush3.bf16.msra.mxu1 %v931_v57  ;;  %v933_v59 = vld [vmem:[%s1289_s4 + $0x8] sm:$0xff]  }
  0x7c   :  { %278 = vmatmul.mubr.bf16.vlgmr.msra.gmra.mrb[0].mxu0 %v139_v58  ;;  %v932_v58 = vld [vmem:[%s1289_s4 + $0x48] sm:$0xff]  }
  0x7d   :  { %805 = vmatprep.mubr.msk.bf16.mxu0 %vm134_vm2, %v142_v40  ;;  %v137_v63 = vsel %vm134_vm2, %v99_v60, %v916_v62  ;;  %v138_v0 = vsel %vm134_vm2, %v93_v33, %v917_v61  ;;  %846 = vmatprep.subr.bf16.mxu1 %v932_v58  ;;  %v934_v60 = vld [vmem:[%s1289_s4 + $0x50] sm:$0xff]   ;;  %v936_v62 = vld [vmem:[%s1289_s4 + $0x58] sm:$0xff]  }
  0x7e   :  { %v141_v1 = vpack.c.bf16 %v138_v0, %v137_v63  ;;  %v935_v61 = vld [vmem:[%s1289_s4 + $0x10] sm:$0xff]   ;;  %v937_v0 = vld [vmem:[%s1289_s4 + $0x18] sm:$0xff]  }
  0x7f   :  { %847 = vmatpush3.bf16.msra.mxu1 %v933_v59  ;;  %v952_v58 = vld [vmem:[%s1289_s4 + $0xb0] sm:$0xff]   ;;  %v953_v59 = vld [vmem:[%s1289_s4 + $0xb8] sm:$0xff]  }
  0x80   :  { %848 = vmatprep.subr.bf16.mxu1 %v934_v60 }
  0x83   :  { %849 = vmatpush3.bf16.msra.mxu1 %v935_v61 }
  0x84   :  { %286 = vmatmul.mubr.bf16.gmra.mrb[4].mxu0 %v141_v1  ;;  %850 = vmatprep.subr.bf16.mxu1 %v936_v62 }
  0x87   :  { %851 = vmatpush3.bf16.msra.mxu1 %v937_v0 }
 0x14f   :  { %v279_v2 = vpop.f32.mrb[0].mxu0 }
 0x150   :  { %v281_v3 = vpop.f32.mrb[1].mxu0 }
 0x151   :  { %v282_v4 = vpop.f32.mrb[2].mxu0  ;;  %v939_v3 = vld [vmem:[%s1289_s4 + $0x20] sm:$0xff]  }
 0x152   :  { %v294_v5 = vadd.f32 %v282_v4, %v279_v2  ;;  %v284_v6 = vpop.f32.mrb[3].mxu0 }
 0x153   :  { %v942_v6 = vld [vmem:[%s1289_s4 + $0x70] sm:$0xff]  }
 0x157   :  { %v287_v7 = vpop.f32.mrb[4].mxu0 }
 0x158   :  { %v295_v8 = vadd.f32 %v294_v5, %v287_v7  ;;  %v289_v9 = vpop.f32.mrb[5].mxu0  ;;  %v941_v5 = vld [vmem:[%s1289_s4 + $0x28] sm:$0xff]  }
 0x159   :  { %v290_v10 = vpop.f32.mrb[6].mxu0  ;;  %v945_v9 = vld [vmem:[%s1289_s4 + $0x38] sm:$0xff]  }
 0x15a   :  { %v296_v11 = vadd.f32 %v295_v8, %v290_v10  ;;  %v292_v13 = vpop.f32.mrb[7].mxu0  ;;  %v944_v8 = vld [vmem:[%s1289_s4 + $0x78] sm:$0xff]  }
 0x15c   :  { %v297_v14 = vrot.slane %v296_v11, 4 }
 0x15e   :  { %v298_v15 = vadd.f32 %v297_v14, %v296_v11 }
 0x160   :  { %v299_v16 = vrot.slane %v298_v15, 2 }
 0x162   :  { %v300_v17 = vadd.f32 %v299_v16, %v298_v15  ;;  %v350_v16 = vld [vmem:[%s1290_s2] sm:$0x1] }
 0x164   :  { %v301_v18 = vrot.slane %v300_v17, 1 }
 0x166   :  { %v302_v19 = vadd.f32 %v301_v18, %v300_v17 }
 0x168   :  { %303 = vrot.lane.b32.xlu1 %v302_v19, %s960_s1 }
 0x1da   :  { %v304_v20 = vpop.permute.xlu1 %303 }
 0x1db   :  { %v305_v21 = vadd.f32 %v304_v20, %v302_v19  ;;  %v806_v20 = vld [vmem:[%s1291_s3] ss:$0 sm:$0xff] }
 0x1dd   :  { %306 = vrot.lane.b32.xlu1 %v305_v21, %s961_s10 }
 0x24f   :  { %v307_v22 = vpop.permute.xlu1 %306 }
 0x250   :  { %v308_v23 = vadd.f32 %v307_v22, %v305_v21 }
 0x252   :  { %309 = vrot.lane.b32.xlu0 %v308_v23, %s962_s12 }
 0x2c4   :  { %v310_v24 = vpop.permute.xlu0 %309 }
 0x2c5   :  { %v311_v26 = vadd.f32 %v310_v24, %v308_v23 }
 0x2c7   :  { %312 = vrot.lane.b32.xlu1 %v311_v26, %s959_s11 }
 0x339   :  { %v313_v27 = vpop.permute.xlu1 %312 }
 0x33a   :  { %v314_v29 = vadd.f32 %v313_v27, %v311_v26 }
 0x33c   :  { %v315_v30 = vmul.f32 0.001953125, %v314_v29 }
 0x33e   :  { %v319_v31 = vrot.slane %v315_v30, %v1125_v28 }
 0x340   :  { %v1128_v32 = vsub.f32 %v279_v2, %v319_v31  ;;  %v1130_v33 = vsub.f32 %v282_v4, %v319_v31  ;;  %v1132_v34 = vsub.f32 %v287_v7, %v319_v31  ;;  %v1134_v35 = vsub.f32 %v290_v10, %v319_v31  ;;  %v938_v2 = vld [vmem:[%s1289_s4 + $0x60] sm:$0xff]   ;;  %v940_v4 = vld [vmem:[%s1289_s4 + $0x68] sm:$0xff]   ;;  %v943_v7 = vld [vmem:[%s1289_s4 + $0x30] sm:$0xff]  }
 0x341   :  { %852 = vmatprep.subr.bf16.mxu1 %v938_v2  ;;  %v946_v10 = vld [vmem:[%s1289_s4 + $0x80] sm:$0xff]  }
 0x342   :  { %v324_v36 = vmul.f32 %v1128_v32, %v1128_v32  ;;  %v325_v38 = vmul.f32 %v1130_v33, %v1130_v33  ;;  %v326_v39 = vmul.f32 %v1132_v34, %v1132_v34  ;;  %v327_v41 = vmul.f32 %v1134_v35, %v1134_v35  ;;  %853 = vmatpush3.bf16.msra.mxu1 %v939_v3 }
 0x343   :  { %854 = vmatprep.subr.bf16.mxu1 %v940_v4 }
 0x344   :  { %v328_v40 = vadd.f32 %v325_v38, %v324_v36 }
 0x346   :  { %v329_v42 = vadd.f32 %v328_v40, %v326_v39  ;;  %855 = vmatpush3.bf16.msra.mxu1 %v941_v5 }
 0x347   :  { %856 = vmatprep.subr.bf16.mxu1 %v942_v6 }
 0x348   :  { %v330_v43 = vadd.f32 %v329_v42, %v327_v41 }
 0x34a   :  { %v331_v44 = vrot.slane %v330_v43, 4  ;;  %857 = vmatpush3.bf16.msra.mxu1 %v943_v7 }
 0x34b   :  { %858 = vmatprep.subr.bf16.mxu1 %v944_v8 }
 0x34c   :  { %v332_v45 = vadd.f32 %v331_v44, %v330_v43 }
 0x34e   :  { %v333_v46 = vrot.slane %v332_v45, 2  ;;  %859 = vmatpush3.bf16.msra.mxu1 %v945_v9 }
 0x34f   :  { %882 = vmatprep.subr.bf16.mxu1 %v946_v10 }
 0x350   :  { %v334_v47 = vadd.f32 %v333_v46, %v332_v45 }
 0x352   :  { %v335_v48 = vrot.slane %v334_v47, 1 }
 0x354   :  { %v336_v50 = vadd.f32 %v335_v48, %v334_v47 }
 0x356   :  { %337 = vrot.lane.b32.xlu0 %v336_v50, %s960_s1 }
 0x3c8   :  { %v338_v51 = vpop.permute.xlu0 %337 }
 0x3c9   :  { %v339_v52 = vadd.f32 %v338_v51, %v336_v50 }
 0x3cb   :  { %340 = vrot.lane.b32.xlu1 %v339_v52, %s961_s10 }
 0x43d   :  { %v341_v54 = vpop.permute.xlu1 %340 }
 0x43e   :  { %v342_v56 = vadd.f32 %v341_v54, %v339_v52 }
 0x440   :  { %343 = vrot.lane.b32.xlu0 %v342_v56, %s962_s12 }
 0x4b2   :  { %v344_v63 = vpop.permute.xlu0 %343 }
 0x4b3   :  { %v345_v1 = vadd.f32 %v344_v63, %v342_v56  ;;  %v949_v56 = vld [vmem:[%s1289_s4 + $0x98] sm:$0xff]  }
 0x4b5   :  { %346 = vrot.lane.b32.xlu1 %v345_v1, %s959_s11 }
 0x527   :  { %v347_v11 = vpop.permute.xlu1 %346 }
 0x528   :  { %v348_v13 = vadd.f32 %v347_v11, %v345_v1 }
 0x52a   :  { %v349_v14 = vmul.f32 0.001953125, %v348_v13 }
 0x52c   :  { %v351_v15 = vadd.f32 1e-05, %v349_v14 }
 0x52e   :  { %954 = vrsqrt.f32 %v351_v15 }
 0x538   :  { %v955_v17 = vpop.eup %954 }
 0x539   :  { %v353_v18 = vmul.f32 %v955_v17, %v350_v16 }
 0x53b   :  { %v358_v19 = vrot.slane %v353_v18, %v1125_v28 }
 0x53d   :  { %v360_v21 = vmul.f32 %v358_v19, %v1128_v32  ;;  %v361_v22 = vmul.f32 %v358_v19, %v1130_v33  ;;  %v363_v23 = vmul.f32 %v358_v19, %v1134_v35  ;;  %v362_v24 = vmul.f32 %v358_v19, %v1132_v34  ;;  %v947_v35 = vld [vmem:[%s1289_s4 + $0x88] sm:$0xff]  }
 0x53f   :  { %v371_v26 = vadd.f32 %v806_v20, %v360_v21  ;;  %v372_v27 = vadd.f32 %v806_v20, %v361_v22  ;;  %v374_v29 = vadd.f32 %v806_v20, %v363_v23  ;;  %v373_v30 = vadd.f32 %v806_v20, %v362_v24 }
 0x541   :  { %v375_v31 = vmax.f32 %v371_v26, 0.0  ;;  %v376_v36 = vmax.f32 %v372_v27, 0.0  ;;  %v378_v38 = vmax.f32 %v374_v29, 0.0  ;;  %v377_v43 = vmax.f32 %v373_v30, 0.0 }
 0x543   :  { %v379_v39 = vrot.slane %v375_v31, 7  ;;  %v380_v40 = vrot.slane %v376_v36, 7  ;;  %v404_v41 = vpack.c.bf16 %v376_v36, %v375_v31  ;;  %v382_v42 = vrot.slane %v378_v38, 7 }
 0x544   :  { %v407_v44 = vpack.c.bf16 %v378_v38, %v377_v43  ;;  %v381_v45 = vrot.slane %v377_v43, 7  ;;  %v391_v46 = vrot.slane %v375_v31, 1  ;;  %v392_v47 = vrot.slane %v376_v36, 1 }
 0x545   :  { %v385_v32 = vsel %vm92_vm3, %v379_v39, %v380_v40  ;;  %633 = vmatprep.mubr.bf16.mxu1 %v404_v41  ;;  %v386_v33 = vsel %vm92_vm3, %v382_v42, %v379_v39  ;;  %v393_v48 = vrot.slane %v377_v43, 1  ;;  %v394_v60 = vrot.slane %v378_v38, 1 }
 0x546   :  { %v832_v34 = vpack.c.bf16 %v385_v32, %v386_v33  ;;  %v383_v50 = vsel %vm92_vm3, %v381_v45, %v382_v42  ;;  %v384_v51 = vsel %vm92_vm3, %v380_v40, %v381_v45  ;;  %v397_v53 = vsel %vm109_vm0, %v391_v46, %v392_v47 }
 0x547   :  { %v396_v52 = vsel %vm109_vm0, %v392_v47, %v393_v48  ;;  %v835_v54 = vpack.c.bf16 %v383_v50, %v384_v51  ;;  %v398_v61 = vsel %vm109_vm0, %v394_v60, %v391_v46  ;;  %v395_v62 = vsel %vm109_vm0, %v393_v48, %v394_v60 }
 0x548   :  { %833 = vmatmul.mubr.msk.bf16.vlgmr.msra.gmra.mrb[0].mxu1 %vm831_vm8, %v832_v34  ;;  %v838_v57 = vpack.c.bf16 %v396_v52, %v397_v53  ;;  %v841_v63 = vpack.c.bf16 %v398_v61, %v395_v62 }
 0x549   :  { %883 = vmatpush3.bf16.msra.mxu1 %v946_v10  ;;  %641 = vmatprep.mubr.bf16.mxu1 %v407_v44 }
 0x54a   :  { %884 = vmatprep.subr.bf16.mxu1 %v947_v35 }
 0x54d   :  { %885 = vmatpush3.bf16.msra.mxu1 %v947_v35 }
 0x54e   :  { %886 = vmatprep.subr.bf16.mxu1 %v948_v49 }
 0x550   :  { %836 = vmatmul.mubr.msk.bf16.gmra.mrb[4].mxu1 %vm834_vm9, %v835_v54 }
 0x551   :  { %887 = vmatpush3.bf16.msra.mxu1 %v948_v49  ;;  %898 = vmatprep.mubr.msk.bf16.mxu1 %vm837_vm10, %v838_v57 }
 0x552   :  { %888 = vmatprep.subr.bf16.mxu1 %v949_v56 }
 0x555   :  { %889 = vmatpush3.bf16.msra.mxu1 %v949_v56 }
 0x556   :  { %890 = vmatprep.subr.bf16.mxu1 %v950_v55 }
 0x559   :  { %891 = vmatpush3.bf16.msra.mxu1 %v950_v55 }
 0x55a   :  { %892 = vmatprep.subr.bf16.mxu1 %v951_v25 }
 0x55d   :  { %893 = vmatpush3.bf16.msra.mxu1 %v951_v25 }
 0x55e   :  { %894 = vmatprep.subr.bf16.mxu1 %v952_v58 }
 0x561   :  { %895 = vmatpush3.bf16.msra.mxu1 %v952_v58 }
 0x562   :  { %896 = vmatprep.subr.bf16.mxu1 %v953_v59 }
 0x565   :  { %897 = vmatpush3.bf16.msra.mxu1 %v953_v59 }
 0x568   :  { %899 = vmatmul.mubr.msk.bf16.vlgmr.msra.gmra.mrb[8].mxu1 %vm840_vm11, %v841_v63 }
 0x61b   :  { %v860_v0 = vpop.f32.mrb[0].mxu1 }
 0x61c   :  { %v861_v1 = vpop.f32.mrb[1].mxu1 }
 0x61d   :  { %v862_v2 = vadd.f32 %v861_v1, %v860_v0  ;;  %v863_v3 = vpop.f32.mrb[2].mxu1 }
 0x61e   :  { %v864_v4 = vpop.f32.mrb[3].mxu1 }
 0x61f   :  { %v865_v5 = vadd.f32 %v864_v4, %v863_v3  ;;  %v755_v3 = vld [vmem:[%s1292_s5] sm:$0x1] }
 0x623   :  { %v866_v6 = vpop.f32.mrb[4].mxu1 }
 0x624   :  { %v867_v7 = vpop.f32.mrb[5].mxu1 }
 0x625   :  { %v868_v8 = vadd.f32 %v867_v7, %v866_v6  ;;  %v869_v9 = vpop.f32.mrb[6].mxu1  ;;  %v843_v7 = vld [vmem:[%s1293_s6] ss:$0 sm:$0xff] }
 0x626   :  { %v870_v10 = vpop.f32.mrb[7].mxu1 }
 0x627   :  { %v871_v12 = vadd.f32 %v870_v10, %v869_v9 }
 0x63b   :  { %v900_v11 = vpop.f32.mrb[8].mxu1 }
 0x63c   :  { %v693_v13 = vadd.f32 %v900_v11, %v868_v8  ;;  %v684_v14 = vpop.f32.mrb[9].mxu1 }
 0x63d   :  { %v685_v15 = vadd.f32 %v862_v2, %v684_v14  ;;  %v901_v37 = vpop.f32.mrb[10].mxu1 }
 0x63e   :  { %v696_v16 = vadd.f32 %v901_v37, %v871_v12  ;;  %v687_v17 = vpop.f32.mrb[11].mxu1 }
 0x63f   :  { %v688_v18 = vadd.f32 %v865_v5, %v687_v17 }
 0x641   :  { %v699_v19 = vadd.f32 %v688_v18, %v685_v15 }
 0x643   :  { %v700_v20 = vadd.f32 %v699_v19, %v693_v13 }
 0x645   :  { %v701_v21 = vadd.f32 %v700_v20, %v696_v16 }
 0x647   :  { %v702_v22 = vrot.slane %v701_v21, 4 }
 0x649   :  { %v703_v23 = vadd.f32 %v702_v22, %v701_v21 }
 0x64b   :  { %v704_v24 = vrot.slane %v703_v23, 2 }
 0x64d   :  { %v705_v26 = vadd.f32 %v704_v24, %v703_v23 }
 0x64f   :  { %v706_v27 = vrot.slane %v705_v26, 1 }
 0x651   :  { %v707_v29 = vadd.f32 %v706_v27, %v705_v26 }
 0x653   :  { %708 = vrot.lane.b32.xlu0 %v707_v29, %s960_s1 }
 0x6c5   :  { %v709_v30 = vpop.permute.xlu0 %708 }
 0x6c6   :  { %v710_v31 = vadd.f32 %v709_v30, %v707_v29 }
 0x6c8   :  { %711 = vrot.lane.b32.xlu1 %v710_v31, %s961_s10 }
 0x73a   :  { %v712_v36 = vpop.permute.xlu1 %711 }
 0x73b   :  { %v713_v38 = vadd.f32 %v712_v36, %v710_v31 }
 0x73d   :  { %714 = vrot.lane.b32.xlu0 %v713_v38, %s962_s12 }
 0x7af   :  { %v715_v39 = vpop.permute.xlu0 %714 }
 0x7b0   :  { %v716_v40 = vadd.f32 %v715_v39, %v713_v38 }
 0x7b2   :  { %717 = vrot.lane.b32.xlu1 %v716_v40, %s959_s11 }
 0x824   :  { %v718_v41 = vpop.permute.xlu1 %717 }
 0x825   :  { %v719_v42 = vadd.f32 %v718_v41, %v716_v40 }
 0x827   :  { %v720_v43 = vmul.f32 0.001953125, %v719_v42 }
 0x829   :  { %v724_v32 = vrot.slane %v720_v43, %v1125_v28 }
 0x82b   :  { %v725_v33 = vsub.f32 %v685_v15, %v724_v32  ;;  %v726_v34 = vsub.f32 %v688_v18, %v724_v32  ;;  %v727_v35 = vsub.f32 %v693_v13, %v724_v32  ;;  %v728_v44 = vsub.f32 %v696_v16, %v724_v32 }
 0x82d   :  { %v729_v45 = vmul.f32 %v725_v33, %v725_v33  ;;  %v730_v46 = vmul.f32 %v726_v34, %v726_v34  ;;  %v731_v47 = vmul.f32 %v727_v35, %v727_v35  ;;  %v732_v49 = vmul.f32 %v728_v44, %v728_v44 }
 0x82f   :  { %v733_v48 = vadd.f32 %v730_v46, %v729_v45 }
 0x831   :  { %v734_v50 = vadd.f32 %v733_v48, %v731_v47 }
 0x833   :  { %v735_v51 = vadd.f32 %v734_v50, %v732_v49 }
 0x835   :  { %v736_v52 = vrot.slane %v735_v51, 4 }
 0x837   :  { %v737_v53 = vadd.f32 %v736_v52, %v735_v51 }
 0x839   :  { %v738_v54 = vrot.slane %v737_v53, 2 }
 0x83b   :  { %v739_v56 = vadd.f32 %v738_v54, %v737_v53 }
 0x83d   :  { %v740_v57 = vrot.slane %v739_v56, 1 }
 0x83f   :  { %v741_v55 = vadd.f32 %v740_v57, %v739_v56 }
 0x841   :  { %742 = vrot.lane.b32.xlu0 %v741_v55, %s960_s1 }
 0x8b3   :  { %v743_v25 = vpop.permute.xlu0 %742 }
 0x8b4   :  { %v744_v58 = vadd.f32 %v743_v25, %v741_v55 }
 0x8b6   :  { %745 = vrot.lane.b32.xlu1 %v744_v58, %s961_s10 }
 0x928   :  { %v746_v59 = vpop.permute.xlu1 %745 }
 0x929   :  { %v747_v60 = vadd.f32 %v746_v59, %v744_v58 }
 0x92b   :  { %748 = vrot.lane.b32.xlu0 %v747_v60, %s962_s12 }
 0x99d   :  { %v749_v61 = vpop.permute.xlu0 %748 }
 0x99e   :  { %v750_v62 = vadd.f32 %v749_v61, %v747_v60 }
 0x9a0   :  { %751 = vrot.lane.b32.xlu1 %v750_v62, %s959_s11 }
 0xa12   :  { %v752_v63 = vpop.permute.xlu1 %751 }
 0xa13   :  { %v753_v0 = vadd.f32 %v752_v63, %v750_v62 }
 0xa15   :  { %v754_v1 = vmul.f32 0.001953125, %v753_v0 }
 0xa17   :  { %v756_v2 = vadd.f32 1e-05, %v754_v1 }
 0xa19   :  { %956 = vrsqrt.f32 %v756_v2 }
 0xa23   :  { %v957_v4 = vpop.eup %956 }
 0xa24   :  { %v758_v5 = vmul.f32 %v957_v4, %v755_v3 }
 0xa26   :  { %v763_v6 = vrot.slane %v758_v5, %v1125_v28 }
 0xa28   :  { %v765_v8 = vmul.f32 %v763_v6, %v725_v33  ;;  %v766_v9 = vmul.f32 %v763_v6, %v726_v34  ;;  %v767_v10 = vmul.f32 %v763_v6, %v727_v35  ;;  %v768_v12 = vmul.f32 %v763_v6, %v728_v44 }
 0xa2a   :  { %v776_v11 = vadd.f32 %v843_v7, %v765_v8  ;;  %v777_v13 = vadd.f32 %v843_v7, %v766_v9  ;;  %v778_v14 = vadd.f32 %v843_v7, %v767_v10  ;;  %v779_v15 = vadd.f32 %v843_v7, %v768_v12 }
 0xa2c   :  { %v780_v37 = vmax.f32 %v776_v11, 0.0  ;;  %v781_v16 = vmax.f32 %v777_v13, 0.0  ;;  %v782_v17 = vmax.f32 %v778_v14, 0.0  ;;  %v783_v18 = vmax.f32 %v779_v15, 0.0 }
 0xa2e   :  { %784 = vst [vmem:[%s1294_s7] sm:$0xff] %v780_v37  ;;  %785 = vst [vmem:[%s1294_s7 + $0x8] sm:$0xff] %v781_v16 }
 0xa2f   :  { %786 = vst [vmem:[%s1294_s7 + $0x10] sm:$0xff] %v782_v17  ;;  %787 = vst [vmem:[%s1294_s7 + $0x18] sm:$0xff] %v783_v18 }

</bundles_post_ra>
